<compile_context>
chip_gen: v5e
topology: v5e:2x2
jax: 0.10.0
libtpu: 0.0.40
codegen_flags: <defaults>
</compile_context>

<pallas_src>
import functools

import jax
import jax.numpy as jnp
import numpy as np
from jax.experimental import pallas as pl
from jax.experimental.pallas import tpu as pltpu


def _round_up(x, m):
    return ((x + m - 1) // m) * m


# ----------------------------- Pallas kernel ---------------------------------
def word_embedding_kernel(ids_ref, w_ref, out_ref):
    # ids_ref : (TN, 1)   int32  token ids for this tile
    # w_ref   : (Vp, Dp)  f32    fused [emb | emb_] table, lane-padded to Dp
    # out_ref : (TN, Dp)  f32    gathered fused embeddings (lane-dense store)
    ids = ids_ref[...]                                        # (TN, 1)
    tn = ids.shape[0]
    vp = w_ref.shape[0]

    # one-hot encode token ids along the vocab axis
    lane = jax.lax.broadcasted_iota(jnp.int32, (tn, vp), 1)   # (TN, Vp)
    onehot = (ids == lane).astype(w_ref.dtype)                # one row per token

    # gather == a single one-hot matmul on the MXU (fused table, no concat)
    out_ref[...] = jnp.dot(
        onehot, w_ref[...], preferred_element_type=jnp.float32
    ).astype(out_ref.dtype)
    # TODO(synk): dropout is identity at inference; training-mode dropout (RNG
    #             mask) is intentionally not applied here.


# ------------------------------- wrapper --------------------------------------
@functools.partial(jax.jit, static_argnames=("tile_n",))
def word_embedding_forward(x, w, w2, *, tile_n=None):
    """x: (B, S) int token ids; w, w2: (ntoken+1, emb_dim) float32 tables."""
    B, S = x.shape
    V, D = w.shape
    N = B * S
    D2 = 2 * D

    # Fuse the two tables: torch.cat((emb(x), emb_(x)), 2) == lookup in [w | w2].
    w_cat = jnp.concatenate(
        [w.astype(jnp.float32), w2.astype(jnp.float32)], axis=1
    )                                                          # (V, 2D)

    # Pad to TPU-friendly shapes:
    #   lanes  : table/output last dim -> multiple of 128 (unmasked stores)
    #   sublane: vocab rows            -> multiple of 8
    Dp = _round_up(D2, 128)
    Vp = _round_up(V, 8)
    w_cat = jnp.pad(w_cat, ((0, Vp - V), (0, Dp - D2)))        # (Vp, Dp)

    # Tile over flattened tokens; at small N the whole problem is one grid step.
    if tile_n is None:
        tile_n = _round_up(N, 8) if N <= 256 else 256
    Np = _round_up(N, tile_n)
    ids = jnp.pad(x.reshape(N).astype(jnp.int32), (0, Np - N)).reshape(Np, 1)

    num_tiles = Np // tile_n
    out = pl.pallas_call(
        word_embedding_kernel,
        out_shape=jax.ShapeDtypeStruct((Np, Dp), jnp.float32),
        grid_spec=pltpu.PrefetchScalarGridSpec(
            num_scalar_prefetch=0,
            grid=(num_tiles,),
            in_specs=[
                pl.BlockSpec((tile_n, 1), lambda i: (i, 0)),   # token-id tile
                pl.BlockSpec((Vp, Dp), lambda i: (0, 0)),      # fused table (resident)
            ],
            out_specs=pl.BlockSpec((tile_n, Dp), lambda i: (i, 0)),
        ),
        compiler_params=pltpu.CompilerParams(
            dimension_semantics=(
                ("parallel",) if num_tiles > 1 else ("arbitrary",)
            )
        ),
    )(ids, w_cat)

    # Drop row/lane padding and restore (B, S, 2D).
    return out[:N, :D2].reshape(B, S, D2)


# --------------------------------- main ---------------------------------------
if __name__ == "__main__":
    # module config (small, consistent with WordEmbedding(ntoken, emb_dim, p, op='c'))
    ntoken = 31
    emb_dim = 32
    B, S = 2, 8
    V = ntoken + 1  # extra row is padding_idx

    key = jax.random.PRNGKey(0)
    k_w, k_w2, k_x = jax.random.split(key, 3)

    # deterministic parameter init; padding_idx row (index ntoken) zeroed,
    # matching nn.Embedding(padding_idx=ntoken)
    w = jax.random.normal(k_w, (V, emb_dim), dtype=jnp.float32)
    w = w.at[ntoken].set(0.0)
    w2 = jax.random.normal(k_w2, (V, emb_dim), dtype=jnp.float32)
    w2 = w2.at[ntoken].set(0.0)

    # token ids in [0, ntoken] (ntoken == padding token)
    x = jax.random.randint(k_x, (B, S), 0, ntoken + 1, dtype=jnp.int32)

    out = word_embedding_forward(x, w, w2)
    out = jax.block_until_ready(out)

    # pure-JAX reference: embedding lookup + concat (dropout = identity)
    ref = jnp.concatenate([jnp.take(w, x, axis=0), jnp.take(w2, x, axis=0)], axis=2)
    np.testing.assert_allclose(np.asarray(out), np.asarray(ref), rtol=1e-6, atol=1e-6)

    print("KERNEL_OK")
</pallas_src>

<mosaic_0001>
module attributes {stable_mosaic.version = 11 : i64} {
  func.func @word_embedding_kernel(%arg0: i32, %arg1: memref<16x1xi32, #tpu.memory_space<vmem>>, %arg2: memref<32x128xf32, #tpu.memory_space<vmem>>, %arg3: memref<16x128xf32, #tpu.memory_space<vmem>>) attributes {dimension_semantics = [#tpu.dimension_semantics<arbitrary>], iteration_bounds = array<i64: 1>, scalar_prefetch = 0 : i64, scratch_operands = 0 : i64, tpu.core_type = #tpu.core_type<tc>, window_params = [{transform_indices = @transform_0, window_bounds = array<i64: 16, 1>}, {pipeline_mode = #tpu.pipeline_mode<synchronous>, transform_indices = @transform_1, window_bounds = array<i64: 32, 128>}, {transform_indices = @transform_2, window_bounds = array<i64: 16, 128>}]} {
    %c0 = arith.constant 0 : index
    %c0_0 = arith.constant 0 : index
    %0 = vector.load %arg1[%c0, %c0_0] : memref<16x1xi32, #tpu.memory_space<vmem>>, vector<16x1xi32>
    %1 = tpu.iota {dimensions = array<i32: 1>} : vector<16x32xi32>
    %2 = vector.broadcast %0 : vector<16x1xi32> to vector<16x32xi32>
    %3 = arith.cmpi eq, %2, %1 : vector<16x32xi32>
    %4 = arith.extui %3 : vector<16x32xi1> to vector<16x32xi32>
    %5 = arith.sitofp %4 : vector<16x32xi32> to vector<16x32xf32>
    %c0_1 = arith.constant 0 : index
    %c0_2 = arith.constant 0 : index
    %6 = vector.load %arg2[%c0_1, %c0_2] : memref<32x128xf32, #tpu.memory_space<vmem>>, vector<32x128xf32>
    %cst = arith.constant dense<0.000000e+00> : vector<16x128xf32>
    %7 = tpu.matmul %5, %6, %cst {dimension_numbers = #tpu.dot_dimension_numbers<[1], [0], [0], [1], [0, 0, 1, 1], [], []>} : vector<16x32xf32>, vector<32x128xf32>, vector<16x128xf32> -> vector<16x128xf32>
    %c0_3 = arith.constant 0 : index
    %c0_4 = arith.constant 0 : index
    %8 = vector.load %arg3[%c0_3, %c0_4] : memref<16x128xf32, #tpu.memory_space<vmem>>, vector<16x128xf32>
    tpu.vector_store %arg3[%c0_3, %c0_4], %7 {strides = array<i32>} : memref<16x128xf32, #tpu.memory_space<vmem>>, vector<16x128xf32>,
    return
  }
  func.func @transform_0(%arg0: i32) -> (i32, i32) {
    %c0_i32 = arith.constant 0 : i32
    %c0_i32_0 = arith.constant 0 : i32
    return %arg0, %c0_i32 : i32, i32
  }
  func.func @transform_1(%arg0: i32) -> (i32, i32) {
    %c0_i32 = arith.constant 0 : i32
    %c0_i32_0 = arith.constant 0 : i32
    %c0_i32_1 = arith.constant 0 : i32
    return %c0_i32, %c0_i32_0 : i32, i32
  }
  func.func @transform_2(%arg0: i32) -> (i32, i32) {
    %c0_i32 = arith.constant 0 : i32
    %c0_i32_0 = arith.constant 0 : i32
    return %arg0, %c0_i32 : i32, i32
  }
}

</mosaic_0001>

<bundles_post_ra>
// kernel: word_embedding_forward.1
= control target key start
LH: loop header
LB: loop body
LE: loop exit
PB: predicated region body
PF: predicated region fallthrough
CT: control target
= control target key end

     0   :  { %v78_v0 = vmov 0   ;;  %v13_v7 = vlaneseq  ;;  %vm31_vm0 = vcmask 261120   ;;  %v79_v10 = vmov 0.0   ;;  %s119_s0 = inlined_call_operand.vmem [shape: s32[16,1], index: 0, kind: input, shape index: {}]   ;;  %s120_s1 = inlined_call_operand.vmem [shape: f32[32,128], index: 1, kind: input, shape index: {}]   ;;  %s121_s2 = inlined_call_operand.vmem [shape: f32[16,128], index: 2, kind: output, shape index: {}]  }
   0x1   :  { %77 = vset.pattern.permute.xlu0 %v78_v0  ;;  %v11_v1 = vld [vmem:[%s119_s0] sm:$0xff]  ;;  %v30_v2 = vld [vmem:[%s120_s1 + $0x18] sm:$0xff]  ;;  %v29_v3 = vld [vmem:[%s120_s1 + $0x10] sm:$0xff] }
   0x2   :  { %16 = vperm.xlu0 %77, %v11_v1   ;;  %50 = vmatpush.msra.mxu0 %v30_v2  ;;  %v28_v4 = vld [vmem:[%s120_s1 + $0x8] sm:$0xff]  ;;  %v27_v6 = vld [vmem:[%s120_s1] sm:$0xff]  ;;  %v14_v8 = vand.u32 127, %v13_v7 }
   0x3   :  { %71 = vmatpush.msra.mxu1 %v30_v2  ;;  %v12_v5 = vld [vmem:[%s119_s0 + $0x8] sm:$0xff] }
   0x4   :  { %51 = vmatpush.msra.mxu0 %v29_v3 }
   0x5   :  { %72 = vmatpush.msra.mxu1 %v29_v3 }
   0x6   :  { %52 = vmatpush.msra.mxu0 %v28_v4 }
   0x7   :  { %73 = vmatpush.msra.mxu1 %v28_v4 }
   0x8   :  { %53 = vmatpush.msra.mxu0 %v27_v6 }
   0x9   :  { %74 = vmatpush.msra.mxu1 %v27_v6 }
   0xa   :  { %19 = vperm.xlu0 %77, %v12_v5  }
  0x74   :  { %v17_v9 = vpop.permute.xlu0 %16 }
  0x75   :  { %vm21_vm1 = vcmp.eq.s32.totalorder %v17_v9, %v14_v8 }
  0x76   :  { %v67_v11 = vsel %vm21_vm1, 1.0, %v79_v10 }
  0x77   :  { %69 = vmatmul.msk.f32.vlgmr.msra.gmra.mxu0 %vm31_vm0, %v67_v11 }
  0x7c   :  { %v20_v12 = vpop.permute.xlu0 %19 }
  0x7d   :  { %vm22_vm2 = vcmp.eq.s32.totalorder %v20_v12, %v14_v8 }
  0x7e   :  { %v68_v13 = vsel %vm22_vm2, 1.0, %v79_v10 }
  0x7f   :  { %70 = vmatmul.msk.f32.vlgmr.msra.gmra.mxu1 %vm31_vm0, %v68_v13 }
  0xf4   :  { %v55_v14 = vpop.f32.mrf.mxu0 }
  0xf5   :  { %61 = vst [vmem:[%s121_s2] sm:$0xff] %v55_v14 }
  0xfc   :  { %v58_v15 = vpop.f32.mrf.mxu1 }
  0xfd   :  { %62 = vst [vmem:[%s121_s2 + $0x8] sm:$0xff] %v58_v15 }

</bundles_post_ra>
